<compile_context>
chip_gen: v6e
topology: v6e:2x2x1
jax: 0.10.0
libtpu: 0.0.40
codegen_flags: <defaults>
</compile_context>

<pallas_src>
import jax
import jax.numpy as jnp
from jax import lax
from jax.experimental import pallas as pl
from jax.experimental.pallas import tpu as pltpu

# ~1 MiB of f32 per plane per pipeline buffer.  With 5 planes (pred, sem,
# 3 normal channels) double-buffered this is ~10 MiB of VMEM, comfortably
# inside the scoped-VMEM limits on v5e / v6e / v7x.
_TARGET_BLOCK_ELEMS = 256 * 1024


def _choose_tile_h(H, W, target_elems):
    tile_h = (target_elems // max(W, 1)) // 8 * 8
    tile_h = max(tile_h, 8)
    if tile_h >= H:
        tile_h = H  # full-H block: always a legal block shape
    return tile_h


def _pack_out(out_ref, s_abs, s_cnt, s_nrm=None):
    # Lane-dense (8, 128) output block: partial sums live in lanes 0..2 of
    # every sublane (full unmasked vector store; wrapper reads row 0).
    lane = lax.broadcasted_iota(jnp.int32, (8, 128), 1)
    if s_nrm is None:
        vals = jnp.where(lane == 0, s_abs, jnp.where(lane == 1, s_cnt, 0.0))
    else:
        vals = jnp.where(
            lane == 0, s_abs,
            jnp.where(lane == 1, s_cnt, jnp.where(lane == 2, s_nrm, 0.0)))
    out_ref[...] = vals


def _make_kernel_with_normal(sky_id, regress_value, sky_normal, inv_sky_norm,
                             tile_h, W, H, needs_mask):
    snx, sny, snz = sky_normal

    def kernel(pred_ref, sem_ref, nrm_ref, out_ref):
        pred = pred_ref[...]                     # (tile_h, W)
        sky = sem_ref[...] == sky_id             # (tile_h, W) bool
        if needs_mask:
            # ragged tail along H handled in-kernel (no wrapper-side padding);
            # masking guarantees OOB garbage never reaches the sums.
            j = pl.program_id(1)
            row = lax.broadcasted_iota(jnp.int32, (tile_h, W), 0)
            sky = sky & ((j * tile_h + row) < H)

        # loss2 pieces: sum(|pred_sky - regress_value|) and sky-pixel count
        s_abs = jnp.sum(jnp.where(sky, jnp.abs(pred - regress_value), 0.0))
        s_cnt = jnp.sum(sky.astype(jnp.float32))

        # normal regularization: cosine similarity against fixed sky normal
        nx = nrm_ref[0]
        ny = nrm_ref[1]
        nz = nrm_ref[2]
        inv_pnorm = lax.rsqrt(jnp.maximum(nx * nx + ny * ny + nz * nz, 1e-16))
        cos = (nx * snx + ny * sny + nz * snz) * (inv_pnorm * inv_sky_norm)
        valid = sky & (cos < 0.999) & (cos > -0.999)
        s_nrm = jnp.sum(jnp.where(valid, 1.0 - cos, 0.0))

        _pack_out(out_ref, s_abs, s_cnt, s_nrm)

    return kernel


def _make_kernel_no_normal(sky_id, regress_value, tile_h, W, H, needs_mask):
    def kernel(pred_ref, sem_ref, out_ref):
        pred = pred_ref[...]
        sky = sem_ref[...] == sky_id
        if needs_mask:
            j = pl.program_id(1)
            row = lax.broadcasted_iota(jnp.int32, (tile_h, W), 0)
            sky = sky & ((j * tile_h + row) < H)

        s_abs = jnp.sum(jnp.where(sky, jnp.abs(pred - regress_value), 0.0))
        s_cnt = jnp.sum(sky.astype(jnp.float32))

        _pack_out(out_ref, s_abs, s_cnt)

    return kernel


def sky_regularization_loss(
    prediction,
    sem_mask,
    prediction_normal=None,
    normal_regress=None,
    loss_weight=0.1,
    sky_id=142,
    regress_value=1.8,
    normal_weight=1.0,
    target_block_elems=_TARGET_BLOCK_ELEMS,
):
    eps = 1e-6
    B, C, H, W = prediction.shape
    assert C == 1, "depth prediction expected with a single channel"

    pred = prediction.astype(jnp.float32)
    # NOTE: ideally the producer hands us an integer sem_mask directly
    # (int32 here; int16/uint8 upstream would shave HBM read bytes further).
    sem = sem_mask.astype(jnp.int32)

    use_normal = (prediction_normal is not None) and (normal_regress is not None)

    tile_h = _choose_tile_h(H, W, target_block_elems)
    num_h = pl.cdiv(H, tile_h)
    needs_mask = (H % tile_h) != 0

    plane_spec = pl.BlockSpec((None, None, tile_h, W), lambda b, j: (b, 0, j, 0))
    out_spec = pl.BlockSpec((None, None, 8, 128), lambda b, j: (b, j, 0, 0))
    out_shape = jax.ShapeDtypeStruct((B, num_h, 8, 128), jnp.float32)
    grid = (B, num_h)
    cparams = pltpu.CompilerParams(
        dimension_semantics=("parallel", "parallel"),
        vmem_limit_bytes=32 * 1024 * 1024,
    )

    if use_normal:
        nrm = prediction_normal.astype(jnp.float32)
        if nrm.shape[1] != 3:
            nrm = nrm[:, :3]
        snx, sny, snz = (float(v) for v in normal_regress)
        snorm = (snx * snx + sny * sny + snz * snz) ** 0.5
        inv_snorm = 1.0 / max(snorm, 1e-8)

        kernel = _make_kernel_with_normal(
            int(sky_id), float(regress_value), (snx, sny, snz), float(inv_snorm),
            tile_h, W, H, needs_mask)
        nrm_spec = pl.BlockSpec((None, 3, tile_h, W), lambda b, j: (b, 0, j, 0))
        partials = pl.pallas_call(
            kernel,
            out_shape=out_shape,
            grid=grid,
            in_specs=[plane_spec, plane_spec, nrm_spec],
            out_specs=out_spec,
            compiler_params=cparams,
        )(pred, sem, nrm)
        sum_abs = jnp.sum(partials[:, :, 0, 0])
        count = jnp.sum(partials[:, :, 0, 1])
        sum_norm = jnp.sum(partials[:, :, 0, 2])
    else:
        kernel = _make_kernel_no_normal(
            int(sky_id), float(regress_value), tile_h, W, H, needs_mask)
        partials = pl.pallas_call(
            kernel,
            out_shape=out_shape,
            grid=grid,
            in_specs=[plane_spec, plane_spec],
            out_specs=out_spec,
            compiler_params=cparams,
        )(pred, sem)
        sum_abs = jnp.sum(partials[:, :, 0, 0])
        count = jnp.sum(partials[:, :, 0, 1])
        sum_norm = jnp.float32(0.0)

    # loss2 = sum(|pred_sky - regress_value|) / (pred_sky.numel() + eps)
    loss = sum_abs / (count + eps)
    if use_normal:
        # loss_norm = sum((1 - cos) * valid_mask) / (sum(sky_mask) + eps)
        loss = loss + normal_weight * (sum_norm / (count + eps))

    # pred_sky.numel() == 0 branch -> torch.sum(prediction) * 0 == 0
    loss = jnp.where(count > 0, loss, jnp.float32(0.0))
    # NaN / inf guard branch
    loss = jnp.where(jnp.isnan(loss) | jnp.isinf(loss), jnp.float32(0.0), loss)

    # TODO(synk): np.random.choice sampling in the torch forward is computed
    # but its result is never used; it is intentionally omitted here.
    return loss * loss_weight


def _reference_loss(prediction, sem_mask, prediction_normal, normal_regress,
                    loss_weight, sky_id, regress_value, normal_weight):
    """Pure-JAX reference mirroring the torch forward."""
    eps = 1e-6
    sky = sem_mask[:, 0] == sky_id
    count = jnp.sum(sky.astype(jnp.float32))
    sum_abs = jnp.sum(jnp.where(sky, jnp.abs(prediction[:, 0] - regress_value), 0.0))
    loss = sum_abs / (count + eps)
    if prediction_normal is not None and normal_regress is not None:
        sn = jnp.asarray(normal_regress, jnp.float32)
        pn = prediction_normal[:, :3].astype(jnp.float32)
        dot = jnp.sum(pn * sn[None, :, None, None], axis=1)
        denom = (jnp.maximum(jnp.sqrt(jnp.sum(pn * pn, axis=1)), 1e-8)
                 * jnp.maximum(jnp.sqrt(jnp.sum(sn * sn)), 1e-8))
        cos = dot / denom
        skyf = sky.astype(jnp.float32)
        valid = skyf * (cos < 0.999) * (cos > -0.999)
        loss = loss + normal_weight * jnp.sum((1.0 - cos) * valid) / (count + eps)
    loss = jnp.where(count > 0, loss, 0.0)
    loss = jnp.where(jnp.isnan(loss) | jnp.isinf(loss), 0.0, loss)
    return loss * loss_weight


if __name__ == "__main__":
    key = jax.random.PRNGKey(0)
    k1, k2, k3, k4, k5, k6 = jax.random.split(key, 6)

    B, H, W = 2, 16, 16
    prediction = jax.random.uniform(k1, (B, 1, H, W), jnp.float32, 0.1, 5.0)
    # semantic ids in {140..144} so a good fraction equals sky_id=142
    sem_mask = jax.random.randint(k2, (B, 1, H, W), 140, 145, jnp.int32)
    prediction_normal = jax.random.normal(k3, (B, 3, H, W), jnp.float32)
    normal_regress = (0.0, 0.0, -1.0)  # deterministic "sky normal" parameter

    # path with surface-normal regularization (3-input kernel)
    loss_n = sky_regularization_loss(
        prediction, sem_mask,
        prediction_normal=prediction_normal, normal_regress=normal_regress,
        loss_weight=0.1, sky_id=142, regress_value=1.8, normal_weight=1.0)
    loss_n = jax.block_until_ready(loss_n)
    ref_n = _reference_loss(prediction, sem_mask, prediction_normal,
                            normal_regress, 0.1, 142, 1.8, 1.0)
    assert loss_n.shape == () and jnp.isfinite(loss_n)
    assert jnp.allclose(loss_n, ref_n, rtol=1e-4, atol=1e-5)

    # path without normals (2-input kernel, no dummy planes streamed)
    loss_d = sky_regularization_loss(
        prediction, sem_mask,
        loss_weight=0.1, sky_id=142, regress_value=1.8)
    loss_d = jax.block_until_ready(loss_d)
    ref_d = _reference_loss(prediction, sem_mask, None, None, 0.1, 142, 1.8, 1.0)
    assert loss_d.shape == () and jnp.isfinite(loss_d)
    assert jnp.allclose(loss_d, ref_d, rtol=1e-4, atol=1e-5)

    # ragged-H path: force a small tile (tile_h=8 < H=20) so the in-kernel
    # tail mask and multi-tile partial-sum combine are exercised.
    B2, H2, W2 = 2, 20, 16
    pred_r = jax.random.uniform(k4, (B2, 1, H2, W2), jnp.float32, 0.1, 5.0)
    sem_r = jax.random.randint(k5, (B2, 1, H2, W2), 140, 145, jnp.int32)
    nrm_r = jax.random.normal(k6, (B2, 3, H2, W2), jnp.float32)
    loss_r = sky_regularization_loss(
        pred_r, sem_r,
        prediction_normal=nrm_r, normal_regress=normal_regress,
        loss_weight=0.1, sky_id=142, regress_value=1.8, normal_weight=1.0,
        target_block_elems=128)
    loss_r = jax.block_until_ready(loss_r)
    ref_r = _reference_loss(pred_r, sem_r, nrm_r, normal_regress,
                            0.1, 142, 1.8, 1.0)
    assert loss_r.shape == () and jnp.isfinite(loss_r)
    assert jnp.allclose(loss_r, ref_r, rtol=1e-4, atol=1e-5)

    print("KERNEL_OK")
</pallas_src>

<mosaic_0001>
module attributes {stable_mosaic.version = 11 : i64} {
  func.func @kernel(%arg0: i32, %arg1: i32, %arg2: memref<1x1x16x16xf32, #tpu.memory_space<vmem>>, %arg3: memref<1x1x16x16xi32, #tpu.memory_space<vmem>>, %arg4: memref<1x3x16x16xf32, #tpu.memory_space<vmem>>, %arg5: memref<1x1x8x128xf32, #tpu.memory_space<vmem>>) attributes {dimension_semantics = [#tpu.dimension_semantics<parallel>, #tpu.dimension_semantics<parallel>], iteration_bounds = array<i64: 2, 1>, scalar_prefetch = 0 : i64, scratch_operands = 0 : i64, tpu.core_type = #tpu.core_type<tc>, window_params = [{transform_indices = @transform_0, window_bounds = array<i64: 1, 1, 16, 16>}, {transform_indices = @transform_1, window_bounds = array<i64: 1, 1, 16, 16>}, {transform_indices = @transform_2, window_bounds = array<i64: 1, 3, 16, 16>}, {transform_indices = @transform_3, window_bounds = array<i64: 1, 1, 8, 128>}]} {
    %c0 = arith.constant 0 : index
    %c0_0 = arith.constant 0 : index
    %c0_1 = arith.constant 0 : index
    %c0_2 = arith.constant 0 : index
    %0 = vector.load %arg2[%c0, %c0_0, %c0_1, %c0_2] : memref<1x1x16x16xf32, #tpu.memory_space<vmem>>, vector<1x1x16x16xf32>
    %1 = vector.shape_cast %0 : vector<1x1x16x16xf32> to vector<16x16xf32>
    %c0_3 = arith.constant 0 : index
    %c0_4 = arith.constant 0 : index
    %c0_5 = arith.constant 0 : index
    %c0_6 = arith.constant 0 : index
    %2 = vector.load %arg3[%c0_3, %c0_4, %c0_5, %c0_6] : memref<1x1x16x16xi32, #tpu.memory_space<vmem>>, vector<1x1x16x16xi32>
    %3 = vector.shape_cast %2 : vector<1x1x16x16xi32> to vector<16x16xi32>
    %c142_i32 = arith.constant 142 : i32
    %4 = vector.broadcast %c142_i32 : i32 to vector<16x16xi32>
    %5 = arith.cmpi eq, %3, %4 : vector<16x16xi32>
    %cst = arith.constant 1.800000e+00 : f32
    %6 = vector.broadcast %cst : f32 to vector<16x16xf32>
    %7 = arith.subf %1, %6 : vector<16x16xf32>
    %8 = math.absf %7 : vector<16x16xf32>
    %cst_7 = arith.constant 0.000000e+00 : f32
    %9 = vector.broadcast %cst_7 : f32 to vector<16x16xf32>
    %10 = arith.select %5, %8, %9 : vector<16x16xi1>, vector<16x16xf32>
    %11 = vector.shape_cast %10 : vector<16x16xf32> to vector<1x16x16xf32>
    %cst_8 = arith.constant dense<0.000000e+00> : vector<1xf32>
    %12 = vector.multi_reduction <add>, %11, %cst_8 [1, 2] : vector<1x16x16xf32> to vector<1xf32>
    %13 = vector.shape_cast %12 : vector<1xf32> to vector<1x1x1xf32>
    %14 = vector.extract %13[0, 0, 0] : f32 from vector<1x1x1xf32>
    %15 = arith.extui %5 : vector<16x16xi1> to vector<16x16xi32>
    %16 = arith.sitofp %15 : vector<16x16xi32> to vector<16x16xf32>
    %17 = vector.shape_cast %16 : vector<16x16xf32> to vector<1x16x16xf32>
    %cst_9 = arith.constant dense<0.000000e+00> : vector<1xf32>
    %18 = vector.multi_reduction <add>, %17, %cst_9 [1, 2] : vector<1x16x16xf32> to vector<1xf32>
    %19 = vector.shape_cast %18 : vector<1xf32> to vector<1x1x1xf32>
    %20 = vector.extract %19[0, 0, 0] : f32 from vector<1x1x1xf32>
    %c0_10 = arith.constant 0 : index
    %c0_11 = arith.constant 0 : index
    %c0_12 = arith.constant 0 : index
    %c0_13 = arith.constant 0 : index
    %21 = vector.load %arg4[%c0_10, %c0_11, %c0_12, %c0_13] : memref<1x3x16x16xf32, #tpu.memory_space<vmem>>, vector<1x1x16x16xf32>
    %22 = vector.shape_cast %21 : vector<1x1x16x16xf32> to vector<16x16xf32>
    %c0_14 = arith.constant 0 : index
    %c1 = arith.constant 1 : index
    %c0_15 = arith.constant 0 : index
    %c0_16 = arith.constant 0 : index
    %23 = vector.load %arg4[%c0_14, %c1, %c0_15, %c0_16] : memref<1x3x16x16xf32, #tpu.memory_space<vmem>>, vector<1x1x16x16xf32>
    %24 = vector.shape_cast %23 : vector<1x1x16x16xf32> to vector<16x16xf32>
    %c0_17 = arith.constant 0 : index
    %c2 = arith.constant 2 : index
    %c0_18 = arith.constant 0 : index
    %c0_19 = arith.constant 0 : index
    %25 = vector.load %arg4[%c0_17, %c2, %c0_18, %c0_19] : memref<1x3x16x16xf32, #tpu.memory_space<vmem>>, vector<1x1x16x16xf32>
    %26 = vector.shape_cast %25 : vector<1x1x16x16xf32> to vector<16x16xf32>
    %27 = arith.mulf %22, %22 : vector<16x16xf32>
    %28 = arith.mulf %24, %24 : vector<16x16xf32>
    %29 = arith.addf %27, %28 : vector<16x16xf32>
    %30 = arith.mulf %26, %26 : vector<16x16xf32>
    %31 = arith.addf %29, %30 : vector<16x16xf32>
    %cst_20 = arith.constant 1.000000e-16 : f32
    %32 = vector.broadcast %cst_20 : f32 to vector<16x16xf32>
    %33 = arith.maximumf %31, %32 : vector<16x16xf32>
    %34 = math.rsqrt %33 : vector<16x16xf32>
    %cst_21 = arith.constant 0.000000e+00 : f32
    %35 = vector.broadcast %cst_21 : f32 to vector<16x16xf32>
    %36 = arith.mulf %22, %35 : vector<16x16xf32>
    %cst_22 = arith.constant 0.000000e+00 : f32
    %37 = vector.broadcast %cst_22 : f32 to vector<16x16xf32>
    %38 = arith.mulf %24, %37 : vector<16x16xf32>
    %39 = arith.addf %36, %38 : vector<16x16xf32>
    %cst_23 = arith.constant -1.000000e+00 : f32
    %40 = vector.broadcast %cst_23 : f32 to vector<16x16xf32>
    %41 = arith.mulf %26, %40 : vector<16x16xf32>
    %42 = arith.addf %39, %41 : vector<16x16xf32>
    %cst_24 = arith.constant 1.000000e+00 : f32
    %43 = vector.broadcast %cst_24 : f32 to vector<16x16xf32>
    %44 = arith.mulf %34, %43 : vector<16x16xf32>
    %45 = arith.mulf %42, %44 : vector<16x16xf32>
    %cst_25 = arith.constant 9.990000e-01 : f32
    %46 = vector.broadcast %cst_25 : f32 to vector<16x16xf32>
    %47 = arith.cmpf olt, %45, %46 : vector<16x16xf32>
    %48 = arith.andi %5, %47 : vector<16x16xi1>
    %cst_26 = arith.constant -9.990000e-01 : f32
    %49 = vector.broadcast %cst_26 : f32 to vector<16x16xf32>
    %50 = arith.cmpf ogt, %45, %49 : vector<16x16xf32>
    %51 = arith.andi %48, %50 : vector<16x16xi1>
    %cst_27 = arith.constant 1.000000e+00 : f32
    %52 = vector.broadcast %cst_27 : f32 to vector<16x16xf32>
    %53 = arith.subf %52, %45 : vector<16x16xf32>
    %cst_28 = arith.constant 0.000000e+00 : f32
    %54 = vector.broadcast %cst_28 : f32 to vector<16x16xf32>
    %55 = arith.select %51, %53, %54 : vector<16x16xi1>, vector<16x16xf32>
    %56 = vector.shape_cast %55 : vector<16x16xf32> to vector<1x16x16xf32>
    %cst_29 = arith.constant dense<0.000000e+00> : vector<1xf32>
    %57 = vector.multi_reduction <add>, %56, %cst_29 [1, 2] : vector<1x16x16xf32> to vector<1xf32>
    %58 = vector.shape_cast %57 : vector<1xf32> to vector<1x1x1xf32>
    %59 = vector.extract %58[0, 0, 0] : f32 from vector<1x1x1xf32>
    %60 = tpu.iota {dimensions = array<i32: 1>} : vector<8x128xi32>
    %c0_i32 = arith.constant 0 : i32
    %61 = vector.broadcast %c0_i32 : i32 to vector<8x128xi32>
    %62 = arith.cmpi eq, %60, %61 : vector<8x128xi32>
    %c1_i32 = arith.constant 1 : i32
    %63 = vector.broadcast %c1_i32 : i32 to vector<8x128xi32>
    %64 = arith.cmpi eq, %60, %63 : vector<8x128xi32>
    %c2_i32 = arith.constant 2 : i32
    %65 = vector.broadcast %c2_i32 : i32 to vector<8x128xi32>
    %66 = arith.cmpi eq, %60, %65 : vector<8x128xi32>
    %cst_30 = arith.constant 0.000000e+00 : f32
    %67 = vector.broadcast %59 : f32 to vector<8x128xf32>
    %68 = vector.broadcast %cst_30 : f32 to vector<8x128xf32>
    %69 = arith.select %66, %67, %68 : vector<8x128xi1>, vector<8x128xf32>
    %70 = vector.broadcast %20 : f32 to vector<8x128xf32>
    %71 = arith.select %64, %70, %69 : vector<8x128xi1>, vector<8x128xf32>
    %72 = vector.broadcast %14 : f32 to vector<8x128xf32>
    %73 = arith.select %62, %72, %71 : vector<8x128xi1>, vector<8x128xf32>
    %c0_31 = arith.constant 0 : index
    %c0_32 = arith.constant 0 : index
    %c0_33 = arith.constant 0 : index
    %c0_34 = arith.constant 0 : index
    %74 = vector.load %arg5[%c0_31, %c0_32, %c0_33, %c0_34] : memref<1x1x8x128xf32, #tpu.memory_space<vmem>>, vector<1x1x8x128xf32>
    %75 = vector.shape_cast %74 : vector<1x1x8x128xf32> to vector<8x128xf32>
    %76 = vector.shape_cast %73 : vector<8x128xf32> to vector<1x1x8x128xf32>
    tpu.vector_store %arg5[%c0_31, %c0_32, %c0_33, %c0_34], %76 {strides = array<i32>} : memref<1x1x8x128xf32, #tpu.memory_space<vmem>>, vector<1x1x8x128xf32>,
    return
  }
  func.func @transform_0(%arg0: i32, %arg1: i32) -> (i32, i32, i32, i32) {
    %c0_i32 = arith.constant 0 : i32
    %c0_i32_0 = arith.constant 0 : i32
    %c0_i32_1 = arith.constant 0 : i32
    return %arg0, %c0_i32, %arg1, %c0_i32_0 : i32, i32, i32, i32
  }
  func.func @transform_1(%arg0: i32, %arg1: i32) -> (i32, i32, i32, i32) {
    %c0_i32 = arith.constant 0 : i32
    %c0_i32_0 = arith.constant 0 : i32
    %c0_i32_1 = arith.constant 0 : i32
    return %arg0, %c0_i32, %arg1, %c0_i32_0 : i32, i32, i32, i32
  }
  func.func @transform_2(%arg0: i32, %arg1: i32) -> (i32, i32, i32, i32) {
    %c0_i32 = arith.constant 0 : i32
    %c0_i32_0 = arith.constant 0 : i32
    %c0_i32_1 = arith.constant 0 : i32
    return %arg0, %c0_i32, %arg1, %c0_i32_0 : i32, i32, i32, i32
  }
  func.func @transform_3(%arg0: i32, %arg1: i32) -> (i32, i32, i32, i32) {
    %c0_i32 = arith.constant 0 : i32
    %c0_i32_0 = arith.constant 0 : i32
    %c0_i32_1 = arith.constant 0 : i32
    return %arg0, %arg1, %c0_i32, %c0_i32_0 : i32, i32, i32, i32
  }
}

</mosaic_0001>

<bundles_post_ra>
// kernel: tpu_custom_call.1
= control target key start
LH: loop header
LB: loop body
LE: loop exit
PB: predicated region body
PF: predicated region fallthrough
CT: control target
= control target key end

     0   :  { %s1088_s0 = inlined_call_operand.hbm [shape: f32[2,1,16,16], index: 0, kind: input, shape index: {}]   ;;  %s1089_s1 = inlined_call_operand.hbm [shape: s32[2,1,16,16], index: 1, kind: input, shape index: {}]   ;;  %s1090_s2 = inlined_call_operand.hbm [shape: f32[2,3,16,16], index: 2, kind: input, shape index: {}]   ;;  %s1091_s3 = inlined_call_operand.hbm [shape: f32[2,1,8,128], index: 3, kind: output, shape index: {}]  }
   0x1   :  { %1096 = sst [smem:[#allocation15_spill]] %s1089_s1 }
   0x2   :  { %8 = vsyncpa [#allocation3], 0 }
   0x3   :  { %10 = vsyncpa [#allocation3 + $0x1], 0 }
   0x4   :  { %11 = vsyncpa [#allocation6], 0 }
   0x5   :  { %13 = vsyncpa [#allocation6 + $0x1], 0 }
   0x6   :  { %14 = vsyncpa [#allocation4], 0 }
   0x7   :  { %16 = vsyncpa [#allocation4 + $0x1], 0  ;;  %s866_s12 = smov 0   ;;  %s868_s13 = smov 0  }
   0x8   :  { %s870_s14 = smov 0   ;;  %s872_s15 = smov 0  }
   0x9   :  { %s874_s16 = smov 0   ;;  %s876_s17 = smov 0  }
   0xa LB: > { %1097 = sst [smem:[#allocation12_spill]] %s825_s14  ;;  %s897_s18 = sadd.s32 4294967295, %s837_s17   ;;  %s837_s17 = sphi %s876_s17, %s22_s17   ;;  %s833_s16 = sphi %s874_s16, %s1115_s16   ;;  %s829_s15 = sphi %s872_s15, %s1114_s15   ;;  %s825_s14 = sphi %s870_s14, %s1110_s14   ;;  %s821_s13 = sphi %s868_s13, %s1113_s13   ;;  %s817_s12 = sphi %s866_s12, %s1112_s12  }
   0xb   : > { %s553_s19 = sadd.s32 4294967294, %s837_s17   ;;  %s34_s20 = sadd.s32 1, %s833_s16 }
   0xc   : > { %s43_s21 = sadd.s32 1, %s825_s14  ;;  %p36_p0 = scmp.ge.s32.totalorder %s34_s20, 2 }
   0xd   : > { %p50_p1 = scmp.ne.s32.totalorder %s825_s14, %s821_s13  ;;  %p51_p2 = scmp.eq.s32.totalorder %s837_s17, 0 }
   0xe   : > { %p56_p3 = scmp.ne.s32.totalorder %s821_s13, %s817_s12  ;;  %s1117_s20 = smov (%p36_p0, %s34_s20), 0 }
   0xf   : > { %1098 = sst [smem:[#allocation13_spill]] %s1117_s20  ;;  %p909_p4 = por %p51_p2, %p50_p1 }
  0x10   : > { %p57_p5 = scmp.eq.s32.totalorder %s897_s18, 0  ;;  %s38_s23 = ssub.s32 %s833_s16, %s1117_s20 }
  0x11   : > { %p138_p6 = scmp.eq.s32.totalorder %s897_s18, 1  ;;  %p41_p7 = scmp.eq.s32.totalorder %s38_s23, 0 }
  0x12   : > { %p917_p8 = por %p57_p5, %p56_p3  ;;  %p144_p10 = scmp.eq.s32.totalorder %s553_s19, 1 }
  0x13   : > { %p921_p9 = por %p138_p6, %p50_p1  ;;  %p612_p13 = scmp.lt.s32.totalorder %s837_s17, 2 }
  0x14   : > { %s926_s26 = scalar_select %p41_p7, %s825_s14, %s43_s21  }
  0x15   : > { %p928_p11 = por %p144_p10, %p56_p3  ;;  %s935_s28 = sand.u32 1, %s825_s14  }
  0x16   : > { %1102 = sst [smem:[#allocation14_spill]] %s926_s26  ;;  %s556_s29 = sshll.u32 %s935_s28, 4 }
  0x17   : > { %s579_s30 = sshll.u32 %s833_s16, 8  ;;  %p941_p0 = pnand %p612_p13, %p909_p4 }
  0x18   : > { %s187_s5 = sand.u32 1, %s837_s17   ;;  %s1105_s1 = sld [smem:[#allocation15_spill]] }
  0x19   : > { %s191_s9 = scalar_lea.vmem [#allocation5], %s556_s29  ;;  %p563_p1 = scmp.ge.s32.totalorder %s837_s17, 1 }
  0x1a   : > { %s200_s10 = sshll.u32 %s191_s9, 4  ;;  %p231_p2 = scmp.lt.s32.totalorder %s837_s17, 3  ;;  %s201_s10 = int_to_ptr.vmem [resolvable:$true] %s200_s10 }
  0x1b   : > { %s955_s11 = scalar_lea.sflag [#allocation6], %s187_s5  ;;  %p671_p3 = pneg %p941_p0 }
  0x1c   : > { %s682_s19 = scalar_lea.vmem %s201_s10, 256  ;;  %s839_s21 = smov [#allocation5]  }
  0x1d   : > { %p683_p4 = scmp.ne.s32.totalorder %s201_s10, %s682_s19  ;;  %s687_s22 = sshll.u32 %s839_s21, 4  ;;  %s688_s22 = int_to_ptr.vmem [resolvable:$false] %s687_s22 }
  0x1e   : > { %s199_s8 = scalar_lea.hbm %s1105_s1, %s579_s30  ;;  %s689_s23 = scalar_lea.vmem %s688_s22, 512 }
  0x1f   : > { %p685_p5 = pnand %p683_p4, %p671_p3  ;;  %p690_p7 = scmp.lt.s32.totalorder %s201_s10, %s688_s22 }
  0x20   : > { %p691_p10 = scmp.lt.s32.totalorder %s689_s23, %s682_s19 }
  0x21   : > { %p686_p6 = pneg %p685_p5 }
  0x22   : > { %p692_p13 = por %p691_p10, %p690_p7 }
  0x24   : > { %p693_p12 = pnand %p692_p13, %p686_p6 }
  0x26   : > { %696 = shalt.err (!%p693_p12)
}
  0x27   : > { %s1094_s6 = smov 128   ;;  %s841_s5 = smov 8  }
  0x28   : > { %604 = dma.hbm_to_vmem [thread:$0]  (!%p941_p0), %s199_s8, 256, %s201_s10, %s955_s11, %s1094_s6, %s1094_s6, %s841_s5  }
  0x29   : > { %p972_p12 = pnand %p563_p1, %p231_p2  ;;  %s176_s21 = scalar_lea.hbm %s1088_s0, %s579_s30 }
  0x2a   : > { %s168_s22 = scalar_lea.vmem [#allocation2], %s556_s29  ;;  %s581_s1 = smul.u32 48, %s935_s28 }
  0x2b   : > { %s177_s23 = sshll.u32 %s168_s22, 4  ;;  %s582_s20 = smul.u32 768, %s833_s16  ;;  %s178_s23 = int_to_ptr.vmem [resolvable:$true] %s177_s23 }
  0x2c   : > { %s165_s26 = scalar_lea.sflag [#allocation3], %s935_s28  ;;  %s710_s14 = scalar_lea.vmem %s178_s23, 256 }
  0x2d   : > { %p711_p4 = scmp.ne.s32.totalorder %s178_s23, %s710_s14  ;;  %s842_s8 = smov [#allocation2]  }
  0x2e   : > { %s715_s10 = sshll.u32 %s842_s8, 4  ;;  %s716_s10 = int_to_ptr.vmem [resolvable:$false] %s715_s10 }
  0x2f   : > { %p713_p1 = pnand %p711_p4, %p671_p3  ;;  %s717_s6 = scalar_lea.vmem %s716_s10, 512 }
  0x30   : > { %p718_p5 = scmp.lt.s32.totalorder %s178_s23, %s716_s10  ;;  %p719_p6 = scmp.lt.s32.totalorder %s717_s6, %s710_s14 }
  0x31   : > { %p714_p2 = pneg %p713_p1 }
  0x32   : > { %p720_p7 = por %p719_p6, %p718_p5 }
  0x34   : > { %p721_p10 = pnand %p720_p7, %p714_p2 }
  0x36   : > { %724 = shalt.err (!%p721_p10)
}
  0x37   : > { %s1107_s29 = smov 128   ;;  %s222_s9 = scalar_lea.hbm %s1090_s2, %s582_s20 }
  0x38   : > { %601 = dma.hbm_to_vmem [thread:$0]  (!%p941_p0), %s176_s21, 256, %s178_s23, %s165_s26, %s1107_s29, %s1107_s29, %s841_s5  }
  0x39   : > { %s214_s19 = scalar_lea.vmem [#allocation7], %s581_s1  ;;  %s843_s14 = smov [#allocation7]  }
  0x3a   : > { %s223_s22 = sshll.u32 %s214_s19, 4  ;;  %s743_s6 = sshll.u32 %s843_s14, 4  ;;  %s224_s22 = int_to_ptr.vmem [resolvable:$true] %s223_s22  ;;  %s744_s6 = int_to_ptr.vmem [resolvable:$false] %s743_s6 }
  0x3b   : > { %s738_s8 = scalar_lea.vmem %s224_s22, 768  ;;  %s745_s10 = scalar_lea.vmem %s744_s6, 1536 }
  0x3c   : > { %p739_p13 = scmp.ne.s32.totalorder %s224_s22, %s738_s8  ;;  %p746_p2 = scmp.lt.s32.totalorder %s224_s22, %s744_s6 }
  0x3d   : > { %p747_p5 = scmp.lt.s32.totalorder %s745_s10, %s738_s8 }
  0x3e   : > { %p741_p4 = pnand %p739_p13, %p671_p3 }
  0x3f   : > { %p748_p6 = por %p747_p5, %p746_p2 }
  0x40   : > { %p742_p1 = pneg %p741_p4 }
  0x42   : > { %p749_p7 = pnand %p748_p6, %p742_p1 }
  0x44   : > { %752 = shalt.err (!%p749_p7)
}
  0x45   : > { %607 = dma.hbm_to_vmem [thread:$0]  (!%p941_p0), %s222_s9, 768, %s224_s22, %s955_s11, %s1107_s29, %s1107_s29, %s841_s5  }
  0x46   : > { %235 = sbr.rel (%p972_p12) target bundleno = 334 (0x14e), region = 32  ;;  %s1009_s1 = sand.u32 (!%p972_p12), 1, %s821_s13  }
  0x47   : > { %s564_s20 = sshll.u32 (!%p972_p12), %s1009_s1, 4  ;;  %s238_s26 = scalar_lea.sflag (!%p972_p12), [#allocation3], %s1009_s1 }
  0x48   : > { %s241_s21 = scalar_lea.vmem (!%p972_p12), [#allocation2], %s564_s20 }
  0x4b   : > { %804 = dma.done.wait (%p917_p8), %s238_s26, 256  }
  0x4c   : > { %806 = vsyncadd (%p917_p8), %s238_s26, 4294967040  ;;  %s246_s4 = sand.u32 1, %s897_s18   ;;  %s250_s5 = scalar_lea.vmem [#allocation5], %s564_s20 }
  0x4d   : > { %s247_s11 = scalar_lea.sflag [#allocation6], %s246_s4 }
  0x4e   : > { %808 = dma.done.wait (%p917_p8), %s247_s11, 1024  }
  0x4f   : > { %810 = vsyncadd (%p917_p8), %s247_s11, 4294966272  ;;  %s583_s7 = smul.u32 48, %s1009_s1  ;;  %v295_v0 = vld [vmem:[%s241_s21] sm:$0xff]  ;;  %v296_v1 = vld [vmem:[%s241_s21 + $0x8] sm:$0xff]  ;;  %v844_v6 = vmov 0.0   ;;  %vm307_vm2 = vcmask 130048  }
  0x50   : > { %v297_v2 = vld [vmem:[%s250_s5] sm:$0xff]  ;;  %v1023_v3 = vld [vmem:[%s250_s5 + $0x8] sm:$0xff]  ;;  %v567_v4 = vadd.f32 -1.8, %v295_v0  ;;  %v568_v5 = vadd.f32 -1.8, %v296_v1 }
  0x51   : > { %vm299_vm0 = vcmp.eq.s32.totalorder %v297_v2, 142  ;;  %vm300_vm1 = vcmp.eq.s32.totalorder %v1023_v3, 142  ;;  %s259_s18 = scalar_lea.vmem [#allocation7], %s583_s7  ;;  %s566_s24 = sshll.u32 %s1009_s1, 3 }
  0x52   : > { %v569_v7 = vsel %vm299_vm0, 1.0, %v844_v6  ;;  %v336_v8 = vld [vmem:[%s259_s18] sm:$0xff]  ;;  %v337_v9 = vld [vmem:[%s259_s18 + $0x8] sm:$0xff]  ;;  %v571_v10 = vld [vmem:[%s259_s18 + $0x10] sm:$0xff]  ;;  %v303_v11 = vand.u32 2147483647, %v567_v4 }
  0x53   : > { %v304_v12 = vand.u32 2147483647, %v568_v5  ;;  %v570_v13 = vsel %vm300_vm1, 1.0, %v844_v6  ;;  %v324_v14 = vsel %vm307_vm2, %v569_v7, 0.0  ;;  %v572_v15 = vld [vmem:[%s259_s18 + $0x18] sm:$0xff]  ;;  %v573_v16 = vld [vmem:[%s259_s18 + $0x20] sm:$0xff]  ;;  %v344_v18 = vmul.f32 %v336_v8, %v336_v8 }
  0x54   : > { %v574_v17 = vld [vmem:[%s259_s18 + $0x28] sm:$0xff]  ;;  %v345_v19 = vmul.f32 %v337_v9, %v337_v9  ;;  %v346_v20 = vmul.f32 %v571_v10, %v571_v10  ;;  %v305_v21 = vsel %vm299_vm0, %v303_v11, 0.0  ;;  %v325_v23 = vsel %vm307_vm2, %v570_v13, 0.0  ;;  %s576_s28 = sshll.u32 %s829_s15, 7  ;;  %s291_s9 = scalar_lea.vmem [#allocation8], %s566_s24 }
  0x55   : > { %v306_v22 = vsel %vm300_vm1, %v304_v12, 0.0  ;;  %v347_v24 = vmul.f32 %v572_v15, %v572_v15  ;;  %v308_v25 = vsel %vm307_vm2, %v305_v21, 0.0  ;;  %v350_v28 = vmul.f32 %v573_v16, %v573_v16  ;;  %s421_s19 = sshll.u32 %s291_s9, 4  ;;  %s1046_s14 = scalar_lea.hbm %s1091_s3, %s576_s28  ;;  %s422_s19 = int_to_ptr.vmem [resolvable:$true] %s421_s19 }
  0x56   : > { %v309_v26 = vsel %vm307_vm2, %v306_v22, 0.0  ;;  %v348_v27 = vadd.f32 %v346_v20, %v344_v18  ;;  %v351_v31 = vmul.f32 %v574_v17, %v574_v17  ;;  %v326_v33 = vadd.f32 %v325_v23, %v324_v14  ;;  %s407_s15 = scalar_lea.sflag [#allocation4], %s1009_s1  ;;  %s753_s6 = scalar_lea.vmem %s422_s19, 128 }
  0x57   : > { %v310_v29 = vadd.f32 %v309_v26, %v308_v25  ;;  %v349_v30 = vadd.f32 %v347_v24, %v345_v19  ;;  %v358_v37 = vmul.f32 0.0, %v336_v8  ;;  %v360_v38 = vmul.f32 0.0, %v571_v10  ;;  %p754_p8 = scmp.ne.s32.totalorder %s422_s19, %s753_s6  ;;  %s845_s10 = smov [#allocation8]  }
  0x58   : > { %v352_v32 = vadd.f32 %v350_v28, %v348_v27  ;;  %v359_v39 = vmul.f32 0.0, %v337_v9  ;;  %v361_v40 = vmul.f32 0.0, %v572_v15  ;;  %v364_v42 = vmul.f32 -1.0, %v573_v16  ;;  %s757_s20 = sshll.u32 %s845_s10, 4  ;;  %s758_s20 = int_to_ptr.vmem [resolvable:$false] %s757_s20 }
  0x59   : > { %311 = vadd.xlane.f32.xlu0 %v310_v29  ;;  %v353_v34 = vadd.f32 %v351_v31, %v349_v30  ;;  %v362_v41 = vadd.f32 %v360_v38, %v358_v37  ;;  %v365_v44 = vmul.f32 -1.0, %v574_v17  ;;  %v394_v15 = vlaneseq  ;;  %p755_p0 = pnand %p754_p8, %p921_p9  ;;  %s759_s26 = scalar_lea.vmem %s758_s20, 256 }
  0x5a   : > { %v354_v35 = vmax.f32 %v352_v32, 1e-16  ;;  %v363_v43 = vadd.f32 %v361_v40, %v359_v39  ;;  %p760_p12 = scmp.lt.s32.totalorder %s422_s19, %s758_s20  ;;  %p761_p10 = scmp.lt.s32.totalorder %s759_s26, %s753_s6 }
  0x5b   : > { %v355_v36 = vmax.f32 %v353_v34, 1e-16  ;;  %v366_v45 = vadd.f32 %v364_v42, %v362_v41  ;;  %v395_v16 = vand.u32 127, %v394_v15  ;;  %p756_p3 = pneg %p755_p0 }
  0x5c   : > { %665 = vrsqrt.f32 %v354_v35  ;;  %v367_v46 = vadd.f32 %v365_v44, %v363_v43  ;;  %p762_p13 = por %p761_p10, %p760_p12 }
  0x5d   : > { %327 = vadd.xlane.f32.xlu0 %v326_v33  ;;  %667 = vrsqrt.f32 %v355_v36  ;;  %vm398_vm11 = vcmp.eq.s32.totalorder %v395_v16, 2  ;;  %vm397_vm12 = vcmp.eq.s32.totalorder %v395_v16, 1  ;;  %vm396_vm13 = vcmp.eq.s32.totalorder %v395_v16, 0 }
  0x5e   : > { %p763_p4 = pnand %p762_p13, %p756_p3 }
  0x69   : > { %v666_v47 = vpop.eup %665 }
  0x6a   : > { %v668_v48 = vpop.eup %667  ;;  %v368_v49 = vmul.f32 %v666_v47, %v366_v45 }
  0x6b   : > { %v369_v50 = vmul.f32 %v668_v48, %v367_v46 }
  0x6c   : > { %vm370_vm3 = vcmp.lt.f32.partialorder %v368_v49, 0.999  ;;  %vm374_vm4 = vcmp.gt.f32.partialorder %v368_v49, -0.999  ;;  %v378_v51 = vsub.f32 1.0, %v368_v49 }
  0x6d   : > { %vm371_vm5 = vcmp.lt.f32.partialorder %v369_v50, 0.999  ;;  %vm372_vm6 = vmand %vm299_vm0, %vm370_vm3  ;;  %vm375_vm7 = vcmp.gt.f32.partialorder %v369_v50, -0.999  ;;  %v379_v52 = vsub.f32 1.0, %v369_v50 }
  0x6e   : > { %vm373_vm8 = vmand %vm300_vm1, %vm371_vm5 }
  0x6f   : > { %vm376_vm9 = vmand %vm372_vm6, %vm374_vm4 }
  0x70   : > { %vm377_vm10 = vmand %vm373_vm8, %vm375_vm7  ;;  %v380_v53 = vsel %vm376_vm9, %v378_v51, 0.0 }
  0x71   : > { %v381_v54 = vsel %vm377_vm10, %v379_v52, 0.0  ;;  %v382_v55 = vsel %vm307_vm2, %v380_v53, 0.0 }
  0x72   : > { %v383_v56 = vsel %vm307_vm2, %v381_v54, 0.0 }
  0x73   : > { %v384_v57 = vadd.f32 %v383_v56, %v382_v55 }
  0x75   : > { %385 = vadd.xlane.f32.xlu1 %v384_v57 }
  0xe2   : > { %v312_v58 = vpop.xlane.xlu0 %311 }
  0xe3   : > { %v313_v59 = vrot.slane %v312_v58, 4 }
  0xe5   : > { %v314_v60 = vadd.f32 %v313_v59, %v312_v58 }
  0xe6   : > { %v328_v61 = vpop.xlane.xlu0 %327 }
  0xe7   : > { %v315_v62 = vrot.slane %v314_v60, 2  ;;  %v329_v63 = vrot.slane %v328_v61, 4 }
  0xe9   : > { %v330_v0 = vadd.f32 %v329_v63, %v328_v61  ;;  %v316_v1 = vadd.f32 %v315_v62, %v314_v60 }
  0xeb   : > { %v331_v2 = vrot.slane %v330_v0, 2  ;;  %v317_v3 = vrot.slane %v316_v1, 1 }
  0xed   : > { %v332_v4 = vadd.f32 %v331_v2, %v330_v0  ;;  %v318_v5 = vadd.f32 %v317_v3, %v316_v1 }
  0xef   : > { %584 = vpush %v318_v5  ;;  %v333_v6 = vrot.slane %v332_v4, 1 }
  0xf1   : > { %v334_v7 = vadd.f32 %v333_v6, %v332_v4 }
  0xf3   : > { %586 = vpush %v334_v7 }
  0xfe   : > { %v386_v8 = vpop.xlane.xlu1 %385 }
  0xff   : > { %v387_v9 = vrot.slane %v386_v8, 4 }
 0x101   : > { %v388_v10 = vadd.f32 %v387_v9, %v386_v8 }
 0x103   : > { %v389_v11 = vrot.slane %v388_v10, 2 }
 0x105   : > { %v390_v12 = vadd.f32 %v389_v11, %v388_v10 }
 0x107   : > { %v391_v13 = vrot.slane %v390_v12, 1 }
 0x109   : > { %v392_v14 = vadd.f32 %v391_v13, %v390_v12 }
 0x10b   : > { %588 = vpush %v392_v14 }
 0x120   : > { %s585_s23 = spop %584 }
 0x121   : > { %v403_v20 = vstv %s585_s23 }
 0x124   : > { %s587_s29 = spop %586 }
 0x125   : > { %v401_v18 = vstv %s587_s29 }
 0x13c   : > { %s589_s30 = spop %588 }
 0x13d   : > { %v399_v17 = vstv %s589_s30 }
 0x13e   : > { %v400_v19 = vsel %vm398_vm11, %v399_v17, 0.0 }
 0x13f   : > { %v402_v21 = vsel %vm397_vm12, %v401_v18, %v400_v19 }
 0x140   : > { %v404_v22 = vsel %vm396_vm13, %v403_v20, %v402_v21 }
 0x141   : > { %405 = vst [vmem:[%s291_s9] sm:$0xff] %v404_v22 }
 0x142   : > { %766 = shalt.err (!%p763_p4)
}
 0x143   : > { %s767_s21 = scalar_lea.hbm %s1046_s14, 128  ;;  %s771_s11 = scalar_lea.hbm %s1091_s3, 256 }
 0x144   : > { %p768_p1 = scmp.ne.s32.totalorder %s1046_s14, %s767_s21  ;;  %p772_p6 = scmp.lt.s32.totalorder %s1046_s14, %s1091_s3 }
 0x145   : > { %p773_p7 = scmp.lt.s32.totalorder %s771_s11, %s767_s21 }
 0x146   : > { %p769_p2 = pnand %p768_p1, %p921_p9 }
 0x147   : > { %p774_p8 = por %p773_p7, %p772_p6 }
 0x148   : > { %p770_p5 = pneg %p769_p2 }
 0x14a   : > { %p775_p0 = pnand %p774_p8, %p770_p5 }
 0x14c   : > { %778 = shalt.err (!%p775_p0)
}
 0x14d   : > { %596 = dma.vmem_to_hbm [thread:$0]  (%p921_p9), %s422_s19, 128, %s1046_s14, %s407_s15  }
 0x14e PF: > { %s433_s18 = sand.u32 1, %s817_s12   ;;  %p1108_p3 = scmp.ge.s32.totalorder %s837_s17, 2 }
 0x14f   : > { %s434_s24 = scalar_lea.sflag [#allocation4], %s433_s18 }
 0x150   : > { %p609_p12 = pnand %p1108_p3, %p928_p11 }
 0x152   : > { %p610_p10 = pneg %p609_p12 }
 0x154   : > { %812 = dma.done.wait (%p610_p10), %s434_s24, 128  }
 0x155   : > { %814 = vsyncadd (%p610_p10), %s434_s24, 4294967168  ;;  %s22_s17 = sadd.s32 1, %s837_s17   ;;  %s1109_s23 = sld [smem:[#allocation12_spill]] }
 0x156   : > { %p19_p13 = scmp.ge.s32.totalorder %s22_s17, 4   ;;  %s1110_s14 = sld [smem:[#allocation14_spill]] }
 0x157   : > { %s1111_s25 = sld [smem:[#allocation13_spill]]  ;;  %s1112_s12 = smov %s821_s13 }
 0x158   : > { %s1114_s15 = smov %s833_s16 }
 0x159   :  { %21 = sbr.rel (!%p19_p13) target bundleno = 10 (0xa), region = 103 }
 0x15b   : > { %s1113_s13 = smov %s1109_s23 }
 0x15d   : > { %s1115_s16 = smov %s1111_s25 }
 0x15e   :  { %439 = vsyncpa [#allocation3], 1 }
 0x15f   :  { %441 = vsyncpa [#allocation3 + $0x1], 1 }
 0x160   :  { %442 = vsyncpa [#allocation6], 1 }
 0x161   :  { %444 = vsyncpa [#allocation6 + $0x1], 1 }
 0x162   :  { %445 = vsyncpa [#allocation4], 1 }
 0x163   :  { %447 = vsyncpa [#allocation4 + $0x1], 1 }

</bundles_post_ra>
